<compile_context>
chip_gen: v5e
topology: v5e:2x2
jax: 0.10.0
libtpu: 0.0.40
codegen_flags: <defaults>
</compile_context>

<pallas_src>
import jax
import jax.numpy as jnp
from jax.experimental import pallas as pl
from jax.experimental.pallas import tpu as pltpu


def _pos_emb_kernel(emb_ref, out_ref):
    # emb_ref: (1, S*H) lane-dense slab holding positional rows 0..S-1.
    # out_ref: (TB, S*H) output slab covering TB batch rows.
    # Sublane broadcast is trivially hidden under the HBM store DMA.
    out_ref[...] = jnp.broadcast_to(emb_ref[...], out_ref.shape)


def positional_embedding_forward(sequence, emb_table):
    """sequence: int array (B, S) -- only its shape is used (matches PyTorch).
    emb_table: (max_len, H) embedding weight.
    Returns (B, S, H) positional embeddings."""
    batch_size, seq_len = sequence.shape
    max_len, hidden = emb_table.shape
    assert seq_len <= max_len, "seq_len must not exceed max_len"

    sh = seq_len * hidden
    dtype_bytes = jnp.dtype(emb_table.dtype).itemsize

    # Lane-dense source slab: rows [0, S) flattened to (1, S*H).  Contiguous
    # slice + reshape: layout plumbing only, no data movement.
    emb_slab = emb_table[:seq_len].reshape(1, sh)

    # Batch tile: largest TB whose output block stays within ~16 MiB per
    # buffer (double-buffered -> ~32 MiB), comfortable on v5e/v6e/v7x under
    # the 48 MiB scoped-VMEM limit below.
    max_block_bytes = 16 * 1024 * 1024
    rows_fit = max(1, max_block_bytes // (sh * dtype_bytes))
    if rows_fit >= batch_size:
        tb = batch_size  # single grid step, whole output in one tile
    else:
        # Multiple-of-8 batch tile (sublane alignment) otherwise.
        tb = min(batch_size, max(8, (rows_fit // 8) * 8))
    grid = (pl.cdiv(batch_size, tb),)

    cost = pl.CostEstimate(
        flops=0,
        transcendentals=0,
        bytes_accessed=(batch_size * sh + sh) * dtype_bytes,
    )

    out_2d = pl.pallas_call(
        _pos_emb_kernel,
        out_shape=jax.ShapeDtypeStruct((batch_size, sh), emb_table.dtype),
        grid_spec=pltpu.PrefetchScalarGridSpec(
            num_scalar_prefetch=0,
            grid=grid,
            in_specs=[
                # Constant (1, S*H) slab: same block index every grid step, so
                # the pipeline keeps it resident (no re-DMA per step).
                pl.BlockSpec((1, sh), lambda b: (0, 0)),
            ],
            out_specs=pl.BlockSpec((tb, sh), lambda b: (b, 0)),
        ),
        compiler_params=pltpu.CompilerParams(
            dimension_semantics=("parallel",),
            vmem_limit_bytes=48 * 1024 * 1024,
        ),
        cost_estimate=cost,
    )(emb_slab)

    # Contiguous reshape back to the PyTorch output layout (free).
    return out_2d.reshape(batch_size, seq_len, hidden)


if __name__ == "__main__":
    # Small shapes consistent with the module.
    max_len = 16
    hidden_size = 32
    batch_size = 2
    seq_len = 8

    key = jax.random.PRNGKey(0)
    k_emb, k_seq = jax.random.split(key)

    # Deterministic "nn.Embedding(max_len, hidden_size)" weight (N(0,1) init).
    emb_table = jax.random.normal(k_emb, (max_len, hidden_size),
                                  dtype=jnp.float32)
    # Token ids -- only the shape matters, matching the PyTorch forward.
    sequence = jax.random.randint(k_seq, (batch_size, seq_len), 0, max_len,
                                  dtype=jnp.int32)

    out = positional_embedding_forward(sequence, emb_table)
    out = jax.block_until_ready(out)

    # Reference check (plain JAX): weight[:S] broadcast over batch.
    ref = jnp.broadcast_to(emb_table[:seq_len][None, :, :],
                           (batch_size, seq_len, hidden_size))
    assert out.shape == (batch_size, seq_len, hidden_size)
    assert jnp.allclose(out, ref)

    print("KERNEL_OK")
</pallas_src>

<mosaic_0001>
module attributes {stable_mosaic.version = 11 : i64} {
  func.func @_pos_emb_kernel(%arg0: i32, %arg1: memref<1x256xf32, #tpu.memory_space<vmem>>, %arg2: memref<2x256xf32, #tpu.memory_space<vmem>>) attributes {dimension_semantics = [#tpu.dimension_semantics<parallel>], iteration_bounds = array<i64: 1>, scalar_prefetch = 0 : i64, scratch_operands = 0 : i64, tpu.core_type = #tpu.core_type<tc>, window_params = [{pipeline_mode = #tpu.pipeline_mode<synchronous>, transform_indices = @transform_0, window_bounds = array<i64: 1, 256>}, {transform_indices = @transform_1, window_bounds = array<i64: 2, 256>}]} {
    %c0 = arith.constant 0 : index
    %c0_0 = arith.constant 0 : index
    %0 = vector.load %arg1[%c0, %c0_0] : memref<1x256xf32, #tpu.memory_space<vmem>>, vector<1x256xf32>
    %1 = vector.shape_cast %0 : vector<1x256xf32> to vector<1x256xf32>
    %2 = vector.broadcast %1 : vector<1x256xf32> to vector<2x256xf32>
    %c0_1 = arith.constant 0 : index
    %c0_2 = arith.constant 0 : index
    %3 = vector.load %arg2[%c0_1, %c0_2] : memref<2x256xf32, #tpu.memory_space<vmem>>, vector<2x256xf32>
    tpu.vector_store %arg2[%c0_1, %c0_2], %2 {strides = array<i32>} : memref<2x256xf32, #tpu.memory_space<vmem>>, vector<2x256xf32>,
    return
  }
  func.func @transform_0(%arg0: i32) -> (i32, i32) {
    %c0_i32 = arith.constant 0 : i32
    %c0_i32_0 = arith.constant 0 : i32
    %c0_i32_1 = arith.constant 0 : i32
    return %c0_i32, %c0_i32_0 : i32, i32
  }
  func.func @transform_1(%arg0: i32) -> (i32, i32) {
    %c0_i32 = arith.constant 0 : i32
    %c0_i32_0 = arith.constant 0 : i32
    return %arg0, %c0_i32 : i32, i32
  }
}

</mosaic_0001>

<bundles_post_ra>
// kernel: tpu_custom_call.1
= control target key start
LH: loop header
LB: loop body
LE: loop exit
PB: predicated region body
PF: predicated region fallthrough
CT: control target
= control target key end

     0   :  { %6 = vsyncpa [#allocation3], 0  ;;  %s121_s0 = inlined_call_operand.hbm [shape: f32[1,256], index: 0, kind: input, shape index: {}]   ;;  %s122_s1 = inlined_call_operand.hbm [shape: f32[2,256], index: 1, kind: output, shape index: {}]  }
   0x1   :  { %7 = vsyncpa [#allocation4], 0  ;;  %s13_s8 = sshll.u32 %s121_s0, 4  ;;  %s103_s9 = smov [#allocation2]   ;;  %s14_s8 = int_to_ptr.hbm [resolvable:$true] %s13_s8 }
   0x2   :  { %s15_s10 = sshll.u32 %s103_s9, 4  ;;  %s16_s10 = int_to_ptr.vmem [resolvable:$true] %s15_s10 }
   0x3   :  { %18 = dma.hbm_to_vmem [thread:$0]  %s14_s8, 32, %s16_s10, [#allocation3]  }
   0x4   :  { %99 = dma.done.wait [#allocation3], 32  }
   0x5   :  { %100 = vsyncadd [#allocation3], 4294967264  ;;  %v23_v0 = vld [vmem:[#allocation2] sm:$0x3]  ;;  %s104_s11 = smov [#allocation5]   ;;  %s39_s15 = sshll.u32 %s122_s1, 4  ;;  %s40_s15 = int_to_ptr.hbm [resolvable:$true] %s39_s15 }
   0x6   :  { %v25_v1 = vperm.slane %v23_v0, 0  ;;  %v26_v2 = vperm.slane %v23_v0, 1  ;;  %s37_s12 = sshll.u32 %s104_s11, 4  ;;  %vm28_vm0 = vcmask 1041408   ;;  %s38_s12 = int_to_ptr.vmem [resolvable:$true] %s37_s12 }
   0x8   :  { %v27_v3 = vrot.slane %v26_v2, 6 }
   0xa   :  { %v29_v4 = vsel %vm28_vm0, %v25_v1, %v27_v3 }
   0xb   :  { %31 = vst [vmem:[#allocation5] sm:$0xf] %v29_v4 }
   0xc   :  { %42 = dma.vmem_to_hbm [thread:$0]  %s38_s12, 64, %s40_s15, [#allocation4]  }
   0xd   :  { %101 = dma.done.wait [#allocation4], 64  }
   0xe   :  { %102 = vsyncadd [#allocation4], 4294967232 }
   0xf   :  { %47 = vsyncpa [#allocation3], 1 }
  0x10   :  { %48 = vsyncpa [#allocation4], 1 }

</bundles_post_ra>
